<compile_context>
chip_gen: v7x
topology: tpu7x:2x2x1
jax: 0.10.0
libtpu: 0.0.40
codegen_flags: <defaults>
</compile_context>

<pallas_src>
import jax
import jax.numpy as jnp
from jax.experimental import pallas as pl
from jax.experimental.pallas import tpu as pltpu

LN_EPS = 1e-5


def _patch_merging_kernel(x_ref, w_ref, b_ref, o_ref):
    # x_ref: (th, 2, Wh, 2C)  [:, 0] = even-h rows -> channels [x0 | x2]
    #                         [:, 1] = odd-h  rows -> channels [x1 | x3]
    # w_ref: (2, 2C, Nout)    LN-gamma-folded reduction weight, [0]=[W0;W2], [1]=[W1;W3]
    # b_ref: (1, Nout)        beta @ W (f32)
    # o_ref: (th * Wh, Nout)
    th, _, wh, c2 = x_ref.shape
    r = th * wh

    x = x_ref[...]
    # Parity slice on a leading (non-tiled) dim is free; the (th, Wh) collapse
    # is a pure relabel when Wh % 8 == 0 (true for the demo shape).
    xe = x[:, 0].astype(jnp.float32).reshape(r, c2)
    xo = x[:, 1].astype(jnp.float32).reshape(r, c2)

    # LayerNorm statistics over the logical 4C channels, kept in f32.
    inv_4c = 1.0 / (2.0 * c2)
    mean = (jnp.sum(xe, axis=-1, keepdims=True)
            + jnp.sum(xo, axis=-1, keepdims=True)) * inv_4c
    ce = xe - mean
    co = xo - mean
    var = (jnp.sum(ce * ce, axis=-1, keepdims=True)
           + jnp.sum(co * co, axis=-1, keepdims=True)) * inv_4c
    inv = jax.lax.rsqrt(var + LN_EPS)              # EUP slot (cheap)

    w0 = w_ref[0]
    w1 = w_ref[1]
    mm_dtype = w0.dtype                            # bf16 by default (host cast)
    acc = jnp.dot(ce.astype(mm_dtype), w0, preferred_element_type=jnp.float32)
    acc = acc + jnp.dot(co.astype(mm_dtype), w1, preferred_element_type=jnp.float32)

    # Per-row scale commutes with the matmul; bias = beta @ W was precomputed.
    out = acc * inv + b_ref[...].astype(jnp.float32)
    o_ref[...] = out.astype(o_ref.dtype)


def _default_vmem_limit_bytes():
    cap = 128 * 1024 * 1024
    try:
        cap = int(pltpu.get_tpu_info().vmem_capacity_bytes)
    except Exception:
        pass  # conservative fallback
    # Half of physical VMEM: 64 MiB on v5e/v6e (128 MiB parts), 32 MiB on v7x
    # (64 MiB parts); leaves headroom for compiler-internal scratch.
    return max(32 * 1024 * 1024, min(cap // 2, 96 * 1024 * 1024))


def _pick_row_block(bhh, per_row_bytes, resident_bytes, budget_bytes):
    """Largest leading-dim block (rows of B*H/2) fitting the VMEM budget."""
    avail = max(budget_bytes - resident_bytes, per_row_bytes)
    th = max(1, int(avail // max(per_row_bytes, 1)))
    th = min(th, bhh)
    # Keep enough grid steps for DMA/compute overlap and v7x megacore
    # sharding: aim for >= 8 steps (>= 4 per TensorCore) on large inputs.
    if bhh >= 64:
        th = min(th, bhh // 8)
    elif bhh >= 16:
        th = min(th, bhh // 2)
    if th < bhh:
        # Keep the flattened output block sublane-aligned: th % 8 == 0.
        th = max(8, th - (th % 8))
        th = min(th, bhh)
    return max(th, 1)


def patch_merging_forward(x, input_resolution, gamma, beta, w_t,
                          *, mm_dtype=jnp.bfloat16, vmem_limit_bytes=None):
    """x: (B, H*W, C) -> (B, (H/2)*(W/2), 2*C).  w_t is (4C, 2C) = torch weight.T."""
    H, W = input_resolution
    B, L, C = x.shape
    assert L == H * W, "input feature has wrong size"
    assert H % 2 == 0 and W % 2 == 0, f"x size ({H}*{W}) are not even."
    Hh, Wh = H // 2, W // 2
    C2, C4 = 2 * C, 4 * C
    assert w_t.shape[0] == C4
    n_out = w_t.shape[1]

    # Free reshape: (B, H*W, C) -> (B*Hh, 2, Wh, 2C).  dim 1 is h-parity; the
    # trailing 2C packs the (w-parity, C) pair, i.e. [x0|x2] / [x1|x3].
    x5 = x.reshape(B * Hh, 2, Wh, C2)
    BHh = B * Hh
    M = BHh * Wh

    # Permute params from the torch concat order [x0,x1,x2,x3] into the
    # ([x0|x2], [x1|x3]) order the kernel consumes, then fold the LN affine
    # into the reduction weight (host-side, f32).
    perm = jnp.array([0, 2, 1, 3])
    g_p = gamma.astype(jnp.float32).reshape(4, C)[perm].reshape(2, C2)
    b_p = beta.astype(jnp.float32).reshape(4, C)[perm].reshape(2, C2)
    w_p = w_t.astype(jnp.float32).reshape(4, C, n_out)[perm].reshape(2, C2, n_out)
    w_fold = (g_p[:, :, None] * w_p).astype(mm_dtype)                    # (2, 2C, n_out)
    bias = (b_p.reshape(1, C4) @ w_p.reshape(C4, n_out)).astype(jnp.float32)  # (1, n_out)

    x_i = x.dtype.itemsize
    mm_i = jnp.dtype(mm_dtype).itemsize
    # Per leading-row VMEM footprint: double-buffered input & output blocks in
    # x.dtype, plus the f32 working set (xe/xo/ce/co), the mm-dtype matmul
    # operands and the f32 accumulator (not double-buffered).
    per_row_bytes = (
        2 * (2 * Wh * C2 * x_i)
        + 2 * (Wh * n_out * x_i)
        + Wh * (4 * C2 * 4 + 2 * C2 * mm_i + n_out * 4)
    )
    # Constant operands are still double-buffered by the pipeline (we do not
    # use pl.Buffered(1) for compatibility), so charge them to the budget.
    resident_bytes = 2 * (2 * C2 * n_out * mm_i) + 2 * (n_out * 4)

    if vmem_limit_bytes is None:
        vmem_limit_bytes = _default_vmem_limit_bytes()
    budget_bytes = (3 * vmem_limit_bytes) // 4

    th = _pick_row_block(BHh, per_row_bytes, resident_bytes, budget_bytes)
    grid = (pl.cdiv(BHh, th),)

    cost = pl.CostEstimate(
        flops=2 * M * C4 * n_out,
        transcendentals=M,
        bytes_accessed=M * C4 * x_i + M * n_out * x_i
        + 2 * C2 * n_out * mm_i + n_out * 4,
    )

    out = pl.pallas_call(
        _patch_merging_kernel,
        out_shape=jax.ShapeDtypeStruct((M, n_out), x.dtype),
        grid_spec=pltpu.PrefetchScalarGridSpec(
            num_scalar_prefetch=0,
            grid=grid,
            in_specs=[
                pl.BlockSpec((th, 2, Wh, C2), lambda i: (i, 0, 0, 0)),   # x (both parities)
                pl.BlockSpec((2, C2, n_out), lambda i: (0, 0, 0)),       # folded weight
                pl.BlockSpec((1, n_out), lambda i: (0, 0)),              # folded bias
            ],
            out_specs=pl.BlockSpec((th * Wh, n_out), lambda i: (i, 0)),
        ),
        compiler_params=pltpu.CompilerParams(
            dimension_semantics=("parallel",),
            vmem_limit_bytes=vmem_limit_bytes,
        ),
        cost_estimate=cost,
    )(x5, w_fold, bias)

    return out.reshape(B, Hh * Wh, n_out)


if __name__ == "__main__":
    # Small shapes consistent with the module: dim=C=4, input_resolution=(16,16)
    B, H, W, C = 2, 16, 16, 4
    key = jax.random.PRNGKey(0)
    kx, kw, kg, kb = jax.random.split(key, 4)

    x = jax.random.normal(kx, (B, H * W, C), dtype=jnp.float32)

    # Deterministic synthetic params (non-trivial gamma/beta to exercise the
    # parameter permutation + affine fold):
    gamma = 1.0 + 0.1 * jax.random.normal(kg, (4 * C,), dtype=jnp.float32)
    beta = 0.1 * jax.random.normal(kb, (4 * C,), dtype=jnp.float32)
    w = jax.random.normal(kw, (2 * C, 4 * C), dtype=jnp.float32) * 0.02
    w_t = w.T  # (4C, 2C)

    # Plain-JAX reference (torch semantics).
    xv = x.reshape(B, H, W, C)
    xm = jnp.concatenate(
        [xv[:, 0::2, 0::2, :], xv[:, 1::2, 0::2, :],
         xv[:, 0::2, 1::2, :], xv[:, 1::2, 1::2, :]], axis=-1
    ).reshape(B, -1, 4 * C)
    mu = xm.mean(-1, keepdims=True)
    va = ((xm - mu) ** 2).mean(-1, keepdims=True)
    ref = ((xm - mu) / jnp.sqrt(va + LN_EPS) * gamma + beta) @ w_t

    # f32 MXU path: tight tolerance (validates the affine fold / permutation).
    out_f32 = patch_merging_forward(x, (H, W), gamma, beta, w_t,
                                    mm_dtype=jnp.float32)
    out_f32 = jax.block_until_ready(out_f32)
    assert out_f32.shape == (B, (H // 2) * (W // 2), 2 * C)
    assert jnp.allclose(out_f32, ref, atol=1e-4, rtol=1e-4)

    # Default bf16-weight MXU path: bf16-appropriate tolerance.
    out_bf16 = jax.block_until_ready(
        patch_merging_forward(x, (H, W), gamma, beta, w_t))
    assert out_bf16.shape == (B, (H // 2) * (W // 2), 2 * C)
    assert jnp.allclose(out_bf16, ref, atol=1e-2, rtol=1e-2)

    print("KERNEL_OK")
</pallas_src>

<mosaic_0001>
module attributes {stable_mosaic.version = 11 : i64} {
  func.func @_patch_merging_kernel(%arg0: i32, %arg1: memref<8x2x8x8xf32, #tpu.memory_space<vmem>>, %arg2: memref<2x8x8xf32, #tpu.memory_space<vmem>>, %arg3: memref<1x8xf32, #tpu.memory_space<vmem>>, %arg4: memref<64x8xf32, #tpu.memory_space<vmem>>) attributes {dimension_semantics = [#tpu.dimension_semantics<parallel>], iteration_bounds = array<i64: 2>, scalar_prefetch = 0 : i64, scratch_operands = 0 : i64, tpu.core_type = #tpu.core_type<tc>, window_params = [{transform_indices = @transform_0, window_bounds = array<i64: 8, 2, 8, 8>}, {pipeline_mode = #tpu.pipeline_mode<synchronous>, transform_indices = @transform_1, window_bounds = array<i64: 2, 8, 8>}, {pipeline_mode = #tpu.pipeline_mode<synchronous>, transform_indices = @transform_2, window_bounds = array<i64: 1, 8>}, {transform_indices = @transform_3, window_bounds = array<i64: 64, 8>}]} {
    %c0 = arith.constant 0 : index
    %c0_0 = arith.constant 0 : index
    %c0_1 = arith.constant 0 : index
    %c0_2 = arith.constant 0 : index
    %0 = vector.load %arg1[%c0, %c0_0, %c0_1, %c0_2] : memref<8x2x8x8xf32, #tpu.memory_space<vmem>>, vector<8x2x8x8xf32>
    %1 = vector.extract_strided_slice %0 {offsets = [0, 0, 0, 0], sizes = [8, 1, 8, 8], strides = [1, 1, 1, 1]} : vector<8x2x8x8xf32> to vector<8x1x8x8xf32>
    %2 = vector.shape_cast %1 : vector<8x1x8x8xf32> to vector<8x8x8xf32>
    %3 = vector.shape_cast %2 : vector<8x8x8xf32> to vector<64x8xf32>
    %4 = vector.extract_strided_slice %0 {offsets = [0, 1, 0, 0], sizes = [8, 1, 8, 8], strides = [1, 1, 1, 1]} : vector<8x2x8x8xf32> to vector<8x1x8x8xf32>
    %5 = vector.shape_cast %4 : vector<8x1x8x8xf32> to vector<8x8x8xf32>
    %6 = vector.shape_cast %5 : vector<8x8x8xf32> to vector<64x8xf32>
    %cst = arith.constant dense<0.000000e+00> : vector<64xf32>
    %7 = vector.multi_reduction <add>, %3, %cst [1] : vector<64x8xf32> to vector<64xf32>
    %8 = vector.shape_cast %7 : vector<64xf32> to vector<64x1xf32>
    %cst_3 = arith.constant dense<0.000000e+00> : vector<64xf32>
    %9 = vector.multi_reduction <add>, %6, %cst_3 [1] : vector<64x8xf32> to vector<64xf32>
    %10 = vector.shape_cast %9 : vector<64xf32> to vector<64x1xf32>
    %11 = arith.addf %8, %10 : vector<64x1xf32>
    %cst_4 = arith.constant 6.250000e-02 : f32
    %12 = vector.broadcast %cst_4 : f32 to vector<64x1xf32>
    %13 = arith.mulf %11, %12 : vector<64x1xf32>
    %14 = vector.broadcast %13 : vector<64x1xf32> to vector<64x8xf32>
    %15 = arith.subf %3, %14 : vector<64x8xf32>
    %16 = vector.broadcast %13 : vector<64x1xf32> to vector<64x8xf32>
    %17 = arith.subf %6, %16 : vector<64x8xf32>
    %18 = arith.mulf %15, %15 : vector<64x8xf32>
    %cst_5 = arith.constant dense<0.000000e+00> : vector<64xf32>
    %19 = vector.multi_reduction <add>, %18, %cst_5 [1] : vector<64x8xf32> to vector<64xf32>
    %20 = vector.shape_cast %19 : vector<64xf32> to vector<64x1xf32>
    %21 = arith.mulf %17, %17 : vector<64x8xf32>
    %cst_6 = arith.constant dense<0.000000e+00> : vector<64xf32>
    %22 = vector.multi_reduction <add>, %21, %cst_6 [1] : vector<64x8xf32> to vector<64xf32>
    %23 = vector.shape_cast %22 : vector<64xf32> to vector<64x1xf32>
    %24 = arith.addf %20, %23 : vector<64x1xf32>
    %cst_7 = arith.constant 6.250000e-02 : f32
    %25 = vector.broadcast %cst_7 : f32 to vector<64x1xf32>
    %26 = arith.mulf %24, %25 : vector<64x1xf32>
    %cst_8 = arith.constant 9.99999974E-6 : f32
    %27 = vector.broadcast %cst_8 : f32 to vector<64x1xf32>
    %28 = arith.addf %26, %27 : vector<64x1xf32>
    %29 = math.rsqrt %28 : vector<64x1xf32>
    %c0_9 = arith.constant 0 : index
    %c0_10 = arith.constant 0 : index
    %c0_11 = arith.constant 0 : index
    %30 = vector.load %arg2[%c0_9, %c0_10, %c0_11] : memref<2x8x8xf32, #tpu.memory_space<vmem>>, vector<1x8x8xf32>
    %31 = vector.shape_cast %30 : vector<1x8x8xf32> to vector<8x8xf32>
    %c1 = arith.constant 1 : index
    %c0_12 = arith.constant 0 : index
    %c0_13 = arith.constant 0 : index
    %32 = vector.load %arg2[%c1, %c0_12, %c0_13] : memref<2x8x8xf32, #tpu.memory_space<vmem>>, vector<1x8x8xf32>
    %33 = vector.shape_cast %32 : vector<1x8x8xf32> to vector<8x8xf32>
    %cst_14 = arith.constant dense<0.000000e+00> : vector<64x8xf32>
    %34 = tpu.matmul %15, %31, %cst_14 {dimension_numbers = #tpu.dot_dimension_numbers<[1], [0], [0], [1], [0, 0, 1, 1], [], []>} : vector<64x8xf32>, vector<8x8xf32>, vector<64x8xf32> -> vector<64x8xf32>
    %cst_15 = arith.constant dense<0.000000e+00> : vector<64x8xf32>
    %35 = tpu.matmul %17, %33, %cst_15 {dimension_numbers = #tpu.dot_dimension_numbers<[1], [0], [0], [1], [0, 0, 1, 1], [], []>} : vector<64x8xf32>, vector<8x8xf32>, vector<64x8xf32> -> vector<64x8xf32>
    %36 = arith.addf %34, %35 : vector<64x8xf32>
    %37 = vector.broadcast %29 : vector<64x1xf32> to vector<64x8xf32>
    %38 = arith.mulf %36, %37 : vector<64x8xf32>
    %c0_16 = arith.constant 0 : index
    %c0_17 = arith.constant 0 : index
    %39 = vector.load %arg3[%c0_16, %c0_17] : memref<1x8xf32, #tpu.memory_space<vmem>>, vector<1x8xf32>
    %40 = vector.broadcast %39 : vector<1x8xf32> to vector<64x8xf32>
    %41 = arith.addf %38, %40 : vector<64x8xf32>
    %c0_18 = arith.constant 0 : index
    %c0_19 = arith.constant 0 : index
    %42 = vector.load %arg4[%c0_18, %c0_19] : memref<64x8xf32, #tpu.memory_space<vmem>>, vector<64x8xf32>
    tpu.vector_store %arg4[%c0_18, %c0_19], %41 {strides = array<i32>} : memref<64x8xf32, #tpu.memory_space<vmem>>, vector<64x8xf32>,
    return
  }
  func.func @transform_0(%arg0: i32) -> (i32, i32, i32, i32) {
    %c0_i32 = arith.constant 0 : i32
    %c0_i32_0 = arith.constant 0 : i32
    %c0_i32_1 = arith.constant 0 : i32
    %c0_i32_2 = arith.constant 0 : i32
    return %arg0, %c0_i32, %c0_i32_0, %c0_i32_1 : i32, i32, i32, i32
  }
  func.func @transform_1(%arg0: i32) -> (i32, i32, i32) {
    %c0_i32 = arith.constant 0 : i32
    %c0_i32_0 = arith.constant 0 : i32
    %c0_i32_1 = arith.constant 0 : i32
    %c0_i32_2 = arith.constant 0 : i32
    return %c0_i32, %c0_i32_0, %c0_i32_1 : i32, i32, i32
  }
  func.func @transform_2(%arg0: i32) -> (i32, i32) {
    %c0_i32 = arith.constant 0 : i32
    %c0_i32_0 = arith.constant 0 : i32
    %c0_i32_1 = arith.constant 0 : i32
    return %c0_i32, %c0_i32_0 : i32, i32
  }
  func.func @transform_3(%arg0: i32) -> (i32, i32) {
    %c0_i32 = arith.constant 0 : i32
    %c0_i32_0 = arith.constant 0 : i32
    return %arg0, %c0_i32 : i32, i32
  }
}

</mosaic_0001>

<bundles_post_ra>
// kernel: tpu_custom_call.1
= control target key start
LH: loop header
LB: loop body
LE: loop exit
PB: predicated region body
PF: predicated region fallthrough
CT: control target
= control target key end

     0   :  { %8 = vsyncpa [#allocation3], 0  ;;  %s1588_s0 = inlined_call_operand.hbm [shape: f32[16,2,8,8], index: 0, kind: input, shape index: {}]   ;;  %s1589_s1 = inlined_call_operand.hbm [shape: f32[2,8,8], index: 1, kind: input, shape index: {}]   ;;  %s1590_s2 = inlined_call_operand.hbm [shape: f32[1,8], index: 2, kind: input, shape index: {}]   ;;  %s1591_s3 = inlined_call_operand.hbm [shape: f32[128,8], index: 3, kind: output, shape index: {}]  }
   0x1   :  { %10 = vsyncpa [#allocation3 + $0x1], 0 }
   0x2   :  { %11 = vsyncpa [#allocation6], 0 }
   0x3   :  { %12 = vsyncpa [#allocation4], 0 }
   0x4   :  { %14 = vsyncpa [#allocation4 + $0x1], 0  ;;  %s1176_s12 = smov 0   ;;  %s1178_s13 = smov 0  }
   0x5   :  { %s1180_s14 = smov 0   ;;  %s1182_s15 = smov 0  }
   0x6 LB: > { %s1197_s16 = sadd.s32 4294967295, %s1146_s15   ;;  %s810_s17 = sadd.s32 4294967294, %s1146_s15   ;;  %s1146_s15 = sphi %s1182_s15, %s1611_s15   ;;  %s1142_s14 = sphi %s1180_s14, %s1610_s14   ;;  %s1138_s13 = sphi %s1178_s13, %s1609_s13   ;;  %s1134_s12 = sphi %s1176_s12, %s1608_s12  }
   0x7   : > { %p40_p0 = scmp.ne.s32.totalorder %s1138_s13, %s1134_s12  ;;  %p1592_p1 = scmp.eq.s32.totalorder %s1197_s16, 0 }
   0x8   : > { %p112_p3 = scmp.eq.s32.totalorder %s810_s17, 1  ;;  %p811_p5 = scmp.ge.s32.totalorder %s1146_s15, 1 }
   0x9   : > { %p1206_p4 = por %p1592_p1, %p40_p0  ;;  %p119_p7 = scmp.lt.s32.totalorder %s1146_s15, 3 }
   0xa   : > { %p1211_p6 = por %p112_p3, %p40_p0  ;;  %s1148_s21 = smov [#allocation5]  }
   0xb   : > { %s1595_s18 = scalar_select %p1206_p4, 1, 0 }
   0xc   : > { %s1596_s19 = scalar_select %p1211_p6, 1, 0 }
   0xd   : > { %p1216_p8 = pnand %p811_p5, %p119_p7  ;;  %s131_s22 = sshll.u32 %s1148_s21, 4  ;;  %s1220_s22 = int_to_ptr.vmem [resolvable:$true] %s131_s22 }
   0xe   : > { %s1149_s24 = smov [#allocation7]   ;;  %s990_s28 = scalar_lea.hbm %s1589_s1, 256 }
   0xf   : > { %p915_p9 = pneg %p1216_p8  ;;  %s145_s25 = sshll.u32 %s1149_s24, 4  ;;  %s1231_s25 = int_to_ptr.vmem [resolvable:$true] %s145_s25 }
  0x10   : > { %p991_p12 = scmp.ne.s32.totalorder %s1589_s1, %s990_s28  ;;  %p997_p5 = scmp.lt.u32.totalorder %s990_s28, %s1589_s1 }
  0x11   : > { %p1227_p11 = pnand %p915_p9, %p1592_p1 }
  0x13   : > { %p992_p13 = pneg %p1227_p11 }
  0x15   : > { %p993_p0 = pnand %p992_p13, %p991_p12 }
  0x17   : > { %p994_p3 = pneg %p993_p0 }
  0x19   : > { %p999_p7 = pnand %p997_p5, %p994_p3 }
  0x1b   : > { %1002 = shalt.err (!%p999_p7)
}
  0x1c   : > { %s1003_s6 = scalar_lea.vmem %s1220_s22, 256  ;;  %p1011_p2 = scmp.lt.s32.totalorder %s1220_s22, %s1220_s22 }
  0x1d   : > { %p1004_p9 = scmp.ne.s32.totalorder %s1220_s22, %s1003_s6  ;;  %p1012_p12 = scmp.lt.s32.totalorder %s1003_s6, %s1003_s6 }
  0x1f   : > { %p1006_p10 = pnand %p1004_p9, %p992_p13  ;;  %p1013_p0 = por %p1012_p12, %p1011_p2 }
  0x21   : > { %p1007_p1 = pneg %p1006_p10 }
  0x23   : > { %p1014_p6 = pnand %p1013_p0, %p1007_p1 }
  0x25   : > { %1017 = shalt.err (!%p1014_p6)
}
  0x26   : > { %s1150_s7 = smov 128   ;;  %s1151_s8 = smov 8  }
  0x27   : > { %918 = dma.hbm_to_vmem [thread:$0]  (!%p1227_p11), %s1589_s1, 256, %s1220_s22, [#allocation6], %s1150_s7, %s1150_s7, %s1151_s8  }
  0x28   : > { %s1018_s21 = scalar_lea.hbm %s1590_s2, 16 }
  0x29   : > { %p1019_p1 = scmp.ne.s32.totalorder %s1590_s2, %s1018_s21  ;;  %p1025_p10 = scmp.lt.u32.totalorder %s1018_s21, %s1590_s2 }
  0x2b   : > { %p1021_p2 = pnand %p1019_p1, %p992_p13 }
  0x2d   : > { %p1022_p6 = pneg %p1021_p2 }
  0x2f   : > { %p1027_p3 = pnand %p1025_p10, %p1022_p6 }
  0x31   : > { %1030 = shalt.err (!%p1027_p3)
}
  0x32   : > { %s1031_s22 = scalar_lea.vmem %s1231_s25, 16  ;;  %s1038_s29 = scalar_lea.vmem %s1231_s25, 32 }
  0x33   : > { %p1032_p5 = scmp.ne.s32.totalorder %s1231_s25, %s1031_s22  ;;  %p1039_p12 = scmp.lt.s32.totalorder %s1231_s25, %s1231_s25 }
  0x34   : > { %p1040_p0 = scmp.lt.s32.totalorder %s1038_s29, %s1031_s22 }
  0x35   : > { %p1034_p7 = pnand %p1032_p5, %p992_p13 }
  0x36   : > { %p1041_p1 = por %p1040_p0, %p1039_p12 }
  0x37   : > { %p1035_p9 = pneg %p1034_p7 }
  0x39   : > { %p1042_p2 = pnand %p1041_p1, %p1035_p9 }
  0x3b   : > { %1045 = shalt.err (!%p1042_p2)
}
  0x3c   : > { %921 = dma.hbm_to_vmem [thread:$0]  (!%p1227_p11), %s1590_s2, 16, %s1231_s25, [#allocation6]  }
  0x3d   : > { %s1290_s5 = sadd.s32 1, %s1146_s15   ;;  %s27_s23 = sadd.s32 1, %s1142_s14 }
  0x3e   : > { %s24_s6 = ssub.s32 %s1146_s15, %s1290_s5  ;;  %p34_p13 = scmp.ne.s32.totalorder %s1142_s14, %s1138_s13 }
  0x3f   : > { %p25_p6 = scmp.eq.s32.totalorder %s24_s6, 0  ;;  %p35_p10 = scmp.eq.s32.totalorder %s1146_s15, 0 }
  0x40   : > { %p1599_p3 = scmp.eq.s32.totalorder %s1197_s16, 1  ;;  %p932_p7 = scmp.lt.s32.totalorder %s1146_s15, 2 }
  0x41   : > { %s1306_s10 = scalar_select %p25_p6, %s1142_s14, %s27_s23  }
  0x42   : > { %p1300_p5 = por %p1599_p3, %p34_p13  ;;  %p36_p9 = por %p35_p10, %p34_p13 }
  0x43   : > { %s156_s11 = sand.u32 1, %s1142_s14   ;;  %s847_s25 = sshll.u32 %s1146_s15, 11 }
  0x44   : > { %s1600_s9 = scalar_select %p1300_p5, 1, 0 }
  0x45   : > { %s815_s17 = sshll.u32 %s156_s11, 7  ;;  %s1313_s26 = scalar_lea.hbm %s1588_s0, %s847_s25 }
  0x46   : > { %s160_s27 = scalar_lea.vmem [#allocation2], %s815_s17  ;;  %p1317_p11 = pnand %p932_p7, %p36_p9 }
  0x47   : > { %s168_s28 = sshll.u32 %s160_s27, 4  ;;  %s1321_s29 = scalar_lea.sflag [#allocation3], %s156_s11  ;;  %s1315_s28 = int_to_ptr.vmem [resolvable:$true] %s168_s28 }
  0x48   : > { %s1046_s30 = scalar_lea.hbm %s1313_s26, 2048  ;;  %p1048_p0 = pneg %p1317_p11 }
  0x49   : > { %p1047_p12 = scmp.ne.s32.totalorder %s1313_s26, %s1046_s30  ;;  %s1051_s6 = scalar_lea.hbm %s1588_s0, 4096 }
  0x4a   : > { %p1052_p13 = scmp.lt.u32.totalorder %s1313_s26, %s1588_s0  ;;  %p1053_p6 = scmp.lt.u32.totalorder %s1051_s6, %s1046_s30 }
  0x4b   : > { %p1049_p1 = pnand %p1048_p0, %p1047_p12  ;;  %p1055_p3 = scmp.lt.u32.totalorder %s1046_s30, %s1313_s26 }
  0x4c   : > { %p1054_p10 = por %p1053_p6, %p1052_p13 }
  0x4d   : > { %p1050_p2 = pneg %p1049_p1 }
  0x4e   : > { %p1056_p7 = por %p1055_p3, %p1054_p10 }
  0x50   : > { %p1057_p9 = pnand %p1056_p7, %p1050_p2 }
  0x52   : > { %1060 = shalt.err (!%p1057_p9)
}
  0x53   : > { %s1061_s11 = scalar_lea.vmem %s1315_s28, 2048  ;;  %s1152_s21 = smov [#allocation2]  }
  0x54   : > { %p1062_p12 = scmp.ne.s32.totalorder %s1315_s28, %s1061_s11  ;;  %s1066_s24 = sshll.u32 %s1152_s21, 4  ;;  %s1067_s24 = int_to_ptr.vmem [resolvable:$false] %s1066_s24 }
  0x55   : > { %s1068_s27 = scalar_lea.vmem %s1067_s24, 4096  ;;  %p1069_p4 = scmp.lt.s32.totalorder %s1315_s28, %s1067_s24 }
  0x56   : > { %p1064_p1 = pnand %p1062_p12, %p1048_p0  ;;  %p1070_p13 = scmp.lt.s32.totalorder %s1068_s27, %s1061_s11 }
  0x58   : > { %p1065_p5 = pneg %p1064_p1  ;;  %p1071_p6 = por %p1070_p13, %p1069_p4 }
  0x5a   : > { %p1072_p10 = pnand %p1071_p6, %p1065_p5 }
  0x5c   : > { %1075 = shalt.err (!%p1072_p10)
}
  0x5d   : > { %925 = dma.hbm_to_vmem [thread:$0]  (!%p1317_p11), %s1313_s26, 2048, %s1315_s28, %s1321_s29, %s1150_s7, %s1150_s7, %s1151_s8  }
  0x5e   : > { %180 = sbr.rel (%p1216_p8) target bundleno = 517 (0x205), region = 32  ;;  %s1355_s30 = sand.u32 (!%p1216_p8), 1, %s1138_s13  }
  0x5f   : > { %s820_s4 = sshll.u32 (!%p1216_p8), %s1355_s30, 7  ;;  %s183_s23 = scalar_lea.sflag (!%p1216_p8), [#allocation3], %s1355_s30 }
  0x60   : > { %s1359_s6 = scalar_lea.vmem (!%p1216_p8), [#allocation2], %s820_s4  ;;  %p1602_p4 = scmp.ne.s32.totalorder (!%p1216_p8), %s1595_s18, 0 }
  0x65   : > { %1121 = dma.done.wait (%p1602_p4), %s183_s23, 2048  }
  0x66   : > { %1123 = vsyncadd (%p1602_p4), %s183_s23, 4294965248  ;;  %p1603_p5 = scmp.eq.s32.totalorder %s1197_s16, 0 }
  0x68   : > { %1125 = dma.done.wait (%p1603_p5), [#allocation6], 272   ;;  %p1604_p8 = pmov %p1603_p5 }
  0x69   : > { %vm235_vm0 = vcmask 64512   ;;  %v1370_v0 = vld [vmem:[%s1359_s6 + $0x10] sm:$0xff]  ;;  %v1373_v1 = vld [vmem:[%s1359_s6] sm:$0xff]  ;;  %v1376_v2 = vld [vmem:[%s1359_s6 + $0x18] sm:$0xff]  ;;  %s823_s18 = sshll.u32 %s1355_s30, 6  ;;  %s848_s7 = sshll.u32 %s1197_s16, 10 }
  0x6a   : > { %1127 = vsyncadd (%p1604_p8), [#allocation6], 4294967024  ;;  %v239_v3 = vsel %vm235_vm0, %v1370_v0, 0.0  ;;  %v236_v4 = vsel %vm235_vm0, %v1373_v1, 0.0  ;;  %v220_v5 = vld [vmem:[%s1359_s6 + $0x8] sm:$0xff]  ;;  %v263_v6 = vsel %vm235_vm0, %v1376_v2, 0.0  ;;  %s1537_s22 = scalar_lea.hbm %s1591_s3, %s848_s7 }
  0x6b   : > { %240 = vadd.xlane.f32.xlu1 %v239_v3  ;;  %237 = vadd.xlane.f32.xlu0 %v236_v4  ;;  %v260_v7 = vsel %vm235_vm0, %v220_v5, 0.0  ;;  %v1387_v8 = vld [vmem:[%s1359_s6 + $0x28] sm:$0xff]  ;;  %v1390_v9 = vld [vmem:[%s1359_s6 + $0x20] sm:$0xff]  ;;  %v1397_v12 = vld [vmem:[%s1359_s6 + $0x38] sm:$0xff]  ;;  %s1513_s20 = scalar_lea.vmem [#allocation8], %s823_s18  ;;  %s705_s16 = scalar_lea.sflag [#allocation4], %s1355_s30 }
  0x6c   : > { %v266_v10 = vsel %vm235_vm0, %v1387_v8, 0.0  ;;  %v242_v11 = vsel %vm235_vm0, %v1390_v9, 0.0  ;;  %v1400_v13 = vld [vmem:[%s1359_s6 + $0x30] sm:$0xff]  ;;  %v269_v14 = vsel %vm235_vm0, %v1397_v12, 0.0  ;;  %v1407_v16 = vld [vmem:[%s1359_s6 + $0x48] sm:$0xff]  ;;  %v1410_v17 = vld [vmem:[%s1359_s6 + $0x40] sm:$0xff] }
  0x6d   : > { %v245_v15 = vsel %vm235_vm0, %v1400_v13, 0.0  ;;  %v272_v18 = vsel %vm235_vm0, %v1407_v16, 0.0  ;;  %v248_v19 = vsel %vm235_vm0, %v1410_v17, 0.0  ;;  %v1417_v20 = vld [vmem:[%s1359_s6 + $0x58] sm:$0xff]  ;;  %v1420_v21 = vld [vmem:[%s1359_s6 + $0x50] sm:$0xff]  ;;  %v1427_v24 = vld [vmem:[%s1359_s6 + $0x68] sm:$0xff] }
  0x6e   : > { %v275_v22 = vsel %vm235_vm0, %v1417_v20, 0.0  ;;  %v251_v23 = vsel %vm235_vm0, %v1420_v21, 0.0  ;;  %v1430_v25 = vld [vmem:[%s1359_s6 + $0x60] sm:$0xff]  ;;  %v278_v26 = vsel %vm235_vm0, %v1427_v24, 0.0  ;;  %v1437_v28 = vld [vmem:[%s1359_s6 + $0x78] sm:$0xff]  ;;  %v1440_v29 = vld [vmem:[%s1359_s6 + $0x70] sm:$0xff] }
  0x6f   : > { %264 = vadd.xlane.f32.xlu1 %v263_v6  ;;  %261 = vadd.xlane.f32.xlu0 %v260_v7  ;;  %v254_v27 = vsel %vm235_vm0, %v1430_v25, 0.0  ;;  %v414_v30 = vld [vmem:[#allocation5 + $0x8] sm:$0xff]  ;;  %v412_v31 = vld [vmem:[#allocation5] sm:$0xff]  ;;  %v281_v32 = vsel %vm235_vm0, %v1437_v28, 0.0  ;;  %v257_v33 = vsel %vm235_vm0, %v1440_v29, 0.0  ;;  %s718_s8 = sshll.u32 %s1513_s20, 4  ;;  %s1539_s8 = int_to_ptr.vmem [resolvable:$true] %s718_s8 }
  0x70   : > { %867 = vmatprep.subr.mxu1 %v414_v30  ;;  %881 = vmatprep.subr.mxu0 %v412_v31  ;;  %s1076_s29 = scalar_lea.vmem %s1539_s8, 1024  ;;  %p1605_p0 = scmp.ne.s32.totalorder %s1600_s9, 0 }
  0x71   : > { %868 = vmatpush3.msra.mxu1 %v414_v30  ;;  %882 = vmatpush3.msra.mxu0 %v412_v31  ;;  %p1077_p11 = scmp.ne.s32.totalorder %s1539_s8, %s1076_s29  ;;  %s1153_s17 = smov [#allocation8]  }
  0x72   : > { %s1080_s25 = sshll.u32 %s1153_s17, 4  ;;  %s1081_s25 = int_to_ptr.vmem [resolvable:$false] %s1080_s25 }
  0x73   : > { %267 = vadd.xlane.f32.xlu1 %v266_v10  ;;  %243 = vadd.xlane.f32.xlu0 %v242_v11  ;;  %p1078_p2 = pnand %p1077_p11, %p1605_p0  ;;  %s1082_s11 = scalar_lea.vmem %s1081_s25, 2048 }
  0x74   : > { %p1083_p7 = scmp.lt.s32.totalorder %s1539_s8, %s1081_s25  ;;  %p1084_p9 = scmp.lt.s32.totalorder %s1082_s11, %s1076_s29 }
  0x75   : > { %p1079_p3 = pneg %p1078_p2 }
  0x76   : > { %p1085_p12 = por %p1084_p9, %p1083_p7 }
  0x77   : > { %270 = vadd.xlane.f32.xlu1 %v269_v14  ;;  %246 = vadd.xlane.f32.xlu0 %v245_v15 }
  0x78   : > { %p1086_p1 = pnand %p1085_p12, %p1079_p3 }
  0x7b   : > { %273 = vadd.xlane.f32.xlu1 %v272_v18  ;;  %249 = vadd.xlane.f32.xlu0 %v248_v19 }
  0x7f   : > { %276 = vadd.xlane.f32.xlu1 %v275_v22  ;;  %252 = vadd.xlane.f32.xlu0 %v251_v23 }
  0x83   : > { %279 = vadd.xlane.f32.xlu1 %v278_v26  ;;  %255 = vadd.xlane.f32.xlu0 %v254_v27 }
  0x87   : > { %282 = vadd.xlane.f32.xlu1 %v281_v32  ;;  %258 = vadd.xlane.f32.xlu0 %v257_v33 }
  0xf8   : > { %v241_v34 = vpop.xlane.xlu1 %240  ;;  %v238_v35 = vpop.xlane.xlu0 %237 }
  0xfc   : > { %v265_v36 = vpop.xlane.xlu1 %264  ;;  %v262_v37 = vpop.xlane.xlu0 %261 }
  0xfd   : > { %v285_v38 = vadd.f32 %v265_v36, %v241_v34  ;;  %v284_v39 = vadd.f32 %v262_v37, %v238_v35 }
  0xff   : > { %v293_v40 = vmul.f32 0.0625, %v285_v38  ;;  %v292_v41 = vmul.f32 0.0625, %v284_v39 }
 0x100   : > { %v268_v42 = vpop.xlane.xlu1 %267  ;;  %v244_v43 = vpop.xlane.xlu0 %243 }
 0x101   : > { %v301_v44 = vsub.f32 %v1370_v0, %v293_v40  ;;  %v1448_v45 = vsub.f32 %v1376_v2, %v293_v40  ;;  %v286_v46 = vadd.f32 %v268_v42, %v244_v43  ;;  %v1450_v47 = vsub.f32 %v220_v5, %v292_v41 }
 0x102   : > { %v300_v48 = vsub.f32 %v1373_v1, %v292_v41 }
 0x103   : > { %v294_v49 = vmul.f32 0.0625, %v286_v46  ;;  %869 = vmatprep.mubr.msk.f32.mxu1 %vm235_vm0, %v1450_v47  ;;  %v317_v50 = vmul.f32 %v301_v44, %v301_v44 }
 0x104   : > { %883 = vmatprep.mubr.msk.f32.mxu0 %vm235_vm0, %v300_v48  ;;  %v271_v51 = vpop.xlane.xlu1 %270  ;;  %870 = vmatmul.mubr.msk.f32.vlgmr.msra.gmra.mrb[0].mxu1 %vm235_vm0, %v1448_v45  ;;  %v247_v52 = vpop.xlane.xlu0 %246  ;;  %v316_v53 = vmul.f32 %v300_v48, %v300_v48 }
 0x105   : > { %v302_v54 = vsub.f32 %v1390_v9, %v294_v49  ;;  %v1460_v55 = vsub.f32 %v1387_v8, %v294_v49  ;;  %884 = vmatmul.mubr.msk.f32.vlgmr.msra.gmra.mrb[0].mxu0 %vm235_vm0, %v301_v44  ;;  %v287_v56 = vadd.f32 %v271_v51, %v247_v52  ;;  %v327_v57 = vsel %vm235_vm0, %v317_v50, 0.0 }
 0x106   : > { %328 = vadd.xlane.f32.xlu1 %v327_v57  ;;  %v324_v58 = vsel %vm235_vm0, %v316_v53, 0.0 }
 0x107   : > { %v295_v59 = vmul.f32 0.0625, %v287_v56  ;;  %325 = vadd.xlane.f32.xlu0 %v324_v58  ;;  %872 = vmatprep.mubr.msk.f32.mxu1 %vm235_vm0, %v1460_v55  ;;  %v318_v60 = vmul.f32 %v302_v54, %v302_v54 }
 0x108   : > { %886 = vmatprep.mubr.msk.f32.mxu0 %vm235_vm0, %v302_v54  ;;  %v274_v61 = vpop.xlane.xlu1 %273  ;;  %v250_v62 = vpop.xlane.xlu0 %249 }
 0x109   : > { %v303_v63 = vsub.f32 %v1400_v13, %v295_v59  ;;  %v311_v0 = vsub.f32 %v1397_v12, %v295_v59  ;;  %v288_v1 = vadd.f32 %v274_v61, %v250_v62  ;;  %v330_v2 = vsel %vm235_vm0, %v318_v60, 0.0 }
 0x10b   : > { %v296_v3 = vmul.f32 0.0625, %v288_v1  ;;  %331 = vadd.xlane.f32.xlu0 %v330_v2  ;;  %873 = vmatmul.mubr.msk.f32.gmra.mrb[2].mxu1 %vm235_vm0, %v311_v0  ;;  %v319_v4 = vmul.f32 %v303_v63, %v303_v63  ;;  %v351_v41 = vmul.f32 %v311_v0, %v311_v0 }
 0x10c   : > { %887 = vmatmul.mubr.msk.f32.gmra.mrb[2].mxu0 %vm235_vm0, %v303_v63  ;;  %v277_v5 = vpop.xlane.xlu1 %276  ;;  %v253_v6 = vpop.xlane.xlu0 %252 }
 0x10d   : > { %v304_v7 = vsub.f32 %v1410_v17, %v296_v3  ;;  %v312_v8 = vsub.f32 %v1407_v16, %v296_v3  ;;  %v289_v9 = vadd.f32 %v277_v5, %v253_v6  ;;  %v333_v10 = vsel %vm235_vm0, %v319_v4, 0.0 }
 0x10e   : > { %334 = vadd.xlane.f32.xlu1 %v333_v10  ;;  %v365_v43 = vsel %vm235_vm0, %v351_v41, 0.0 }
 0x10f   : > { %v297_v11 = vmul.f32 0.0625, %v289_v9  ;;  %875 = vmatprep.mubr.msk.f32.mxu1 %vm235_vm0, %v312_v8  ;;  %889 = vmatprep.mubr.msk.f32.mxu0 %vm235_vm0, %v304_v7  ;;  %v320_v12 = vmul.f32 %v304_v7, %v304_v7  ;;  %v352_v40 = vmul.f32 %v312_v8, %v312_v8 }
 0x110   : > { %v280_v13 = vpop.xlane.xlu1 %279  ;;  %v256_v14 = vpop.xlane.xlu0 %255 }
 0x111   : > { %v305_v15 = vsub.f32 %v1420_v21, %v297_v11  ;;  %v313_v18 = vsub.f32 %v1417_v20, %v297_v11  ;;  %v290_v19 = vadd.f32 %v280_v13, %v256_v14  ;;  %v336_v17 = vsel %vm235_vm0, %v320_v12, 0.0 }
 0x112   : > { %337 = vadd.xlane.f32.xlu0 %v336_v17  ;;  %v368_v42 = vsel %vm235_vm0, %v352_v40, 0.0 }
 0x113   : > { %v298_v16 = vmul.f32 0.0625, %v290_v19  ;;  %876 = vmatmul.mubr.msk.f32.gmra.mrb[4].mxu1 %vm235_vm0, %v313_v18  ;;  %890 = vmatmul.mubr.msk.f32.gmra.mrb[4].mxu0 %vm235_vm0, %v305_v15  ;;  %v321_v22 = vmul.f32 %v305_v15, %v305_v15  ;;  %v353_v46 = vmul.f32 %v313_v18, %v313_v18 }
 0x114   : > { %v283_v23 = vpop.xlane.xlu1 %282  ;;  %v259_v26 = vpop.xlane.xlu0 %258 }
 0x115   : > { %v306_v27 = vsub.f32 %v1430_v25, %v298_v16  ;;  %v314_v30 = vsub.f32 %v1427_v24, %v298_v16  ;;  %v291_v31 = vadd.f32 %v283_v23, %v259_v26  ;;  %v339_v21 = vsel %vm235_vm0, %v321_v22, 0.0 }
 0x116   : > { %340 = vadd.xlane.f32.xlu1 %v339_v21  ;;  %v348_v25 = vmul.f32 %v1450_v47, %v1450_v47  ;;  %v371_v47 = vsel %vm235_vm0, %v353_v46, 0.0  ;;  %v1509_v21 = vld [vmem:[#allocation7] ss:$0 sm:$0xff] }
 0x117   : > { %v299_v20 = vmul.f32 0.0625, %v291_v31  ;;  %878 = vmatprep.mubr.msk.f32.mxu1 %vm235_vm0, %v314_v30  ;;  %892 = vmatprep.mubr.msk.f32.mxu0 %vm235_vm0, %v306_v27  ;;  %v322_v32 = vmul.f32 %v306_v27, %v306_v27  ;;  %v354_v44 = vmul.f32 %v314_v30, %v314_v30 }
 0x118   : > { %v356_v36 = vsel %vm235_vm0, %v348_v25, 0.0 }
 0x119   : > { %v307_v33 = vsub.f32 %v1440_v29, %v299_v20  ;;  %v315_v34 = vsub.f32 %v1437_v28, %v299_v20  ;;  %v342_v35 = vsel %vm235_vm0, %v322_v32, 0.0  ;;  %v350_v29 = vmul.f32 %v1460_v55, %v1460_v55 }
 0x11a   : > { %343 = vadd.xlane.f32.xlu0 %v342_v35  ;;  %v349_v28 = vmul.f32 %v1448_v45, %v1448_v45  ;;  %v374_v45 = vsel %vm235_vm0, %v354_v44, 0.0 }
 0x11b   : > { %879 = vmatmul.mubr.msk.f32.gmra.mrb[6].mxu1 %vm235_vm0, %v315_v34  ;;  %893 = vmatmul.mubr.msk.f32.gmra.mrb[6].mxu0 %vm235_vm0, %v307_v33  ;;  %v323_v24 = vmul.f32 %v307_v33, %v307_v33  ;;  %v362_v38 = vsel %vm235_vm0, %v350_v29, 0.0  ;;  %v355_v48 = vmul.f32 %v315_v34, %v315_v34 }
 0x11c   : > { %v359_v39 = vsel %vm235_vm0, %v349_v28, 0.0 }
 0x11d   : > { %v345_v37 = vsel %vm235_vm0, %v323_v24, 0.0  ;;  %v377_v49 = vsel %vm235_vm0, %v355_v48, 0.0 }
 0x11e   : > { %357 = vadd.xlane.f32.xlu0 %v356_v36  ;;  %346 = vadd.xlane.f32.xlu1 %v345_v37 }
 0x122   : > { %363 = vadd.xlane.f32.xlu0 %v362_v38  ;;  %360 = vadd.xlane.f32.xlu1 %v359_v39 }
 0x126   : > { %369 = vadd.xlane.f32.xlu0 %v368_v42  ;;  %366 = vadd.xlane.f32.xlu1 %v365_v43 }
 0x12a   : > { %375 = vadd.xlane.f32.xlu0 %v374_v45  ;;  %372 = vadd.xlane.f32.xlu1 %v371_v47 }
 0x12e   : > { %378 = vadd.xlane.f32.xlu1 %v377_v49 }
 0x193   : > { %v329_v51 = vpop.xlane.xlu1 %328 }
 0x194   : > { %v326_v50 = vpop.xlane.xlu0 %325 }
 0x198   : > { %v332_v53 = vpop.xlane.xlu0 %331 }
 0x19b   : > { %v335_v52 = vpop.xlane.xlu1 %334 }
 0x19f   : > { %v338_v55 = vpop.xlane.xlu0 %337 }
 0x1a3   : > { %v341_v54 = vpop.xlane.xlu1 %340 }
 0x1a7   : > { %v344_v57 = vpop.xlane.xlu0 %343 }
 0x1ab   : > { %v347_v56 = vpop.xlane.xlu1 %346  ;;  %v358_v59 = vpop.xlane.xlu0 %357 }
 0x1ac   : > { %v380_v61 = vadd.f32 %v358_v59, %v326_v50 }
 0x1ae   : > { %v388_v0 = vmul.f32 0.0625, %v380_v61 }
 0x1af   : > { %v361_v58 = vpop.xlane.xlu1 %360  ;;  %v364_v1 = vpop.xlane.xlu0 %363 }
 0x1b0   : > { %v381_v60 = vadd.f32 %v361_v58, %v329_v51  ;;  %v382_v4 = vadd.f32 %v364_v1, %v332_v53  ;;  %v396_v5 = vadd.f32 1e-05, %v388_v0 }
 0x1b2   : > { %v389_v62 = vmul.f32 0.0625, %v381_v60  ;;  %v390_v8 = vmul.f32 0.0625, %v382_v4 }
 0x1b3   : > { %v367_v63 = vpop.xlane.xlu1 %366  ;;  %v370_v9 = vpop.xlane.xlu0 %369 }
 0x1b4   : > { %v383_v2 = vadd.f32 %v367_v63, %v335_v52  ;;  %v397_v3 = vadd.f32 1e-05, %v389_v62  ;;  %v384_v12 = vadd.f32 %v370_v9, %v338_v55  ;;  %v398_v13 = vadd.f32 1e-05, %v390_v8 }
 0x1b6   : > { %v391_v6 = vmul.f32 0.0625, %v383_v2  ;;  %974 = vrsqrt.f32 %v397_v3  ;;  %v392_v18 = vmul.f32 0.0625, %v384_v12 }
 0x1b7   : > { %v373_v7 = vpop.xlane.xlu1 %372  ;;  %976 = vrsqrt.f32 %v396_v5  ;;  %v376_v15 = vpop.xlane.xlu0 %375 }
 0x1b8   : > { %v385_v10 = vadd.f32 %v373_v7, %v341_v54  ;;  %v399_v11 = vadd.f32 1e-05, %v391_v6  ;;  %v400_v33 = vadd.f32 1e-05, %v392_v18  ;;  %v386_v34 = vadd.f32 %v376_v15, %v344_v57 }
 0x1ba   : > { %v393_v14 = vmul.f32 0.0625, %v385_v10  ;;  %978 = vrsqrt.f32 %v399_v11  ;;  %v394_v28 = vmul.f32 0.0625, %v386_v34 }
 0x1bb   : > { %v379_v19 = vpop.xlane.xlu1 %378  ;;  %980 = vrsqrt.f32 %v398_v13 }
 0x1bc   : > { %v401_v30 = vadd.f32 1e-05, %v393_v14  ;;  %v387_v31 = vadd.f32 %v379_v19, %v347_v56  ;;  %v402_v47 = vadd.f32 1e-05, %v394_v28 }
 0x1be   : > { %982 = vrsqrt.f32 %v401_v30  ;;  %v395_v36 = vmul.f32 0.0625, %v387_v31 }
 0x1bf   : > { %984 = vrsqrt.f32 %v400_v33 }
 0x1c0   : > { %v975_v27 = vpop.eup %974  ;;  %v403_v46 = vadd.f32 1e-05, %v395_v36 }
 0x1c1   : > { %v977_v32 = vpop.eup %976 }
 0x1c2   : > { %986 = vrsqrt.f32 %v403_v46 }
 0x1c3   : > { %988 = vrsqrt.f32 %v402_v47 }
 0x1c4   : > { %v979_v42 = vpop.eup %978 }
 0x1c5   : > { %v981_v44 = vpop.eup %980 }
 0x1c8   : > { %v983_v56 = vpop.eup %982 }
 0x1c9   : > { %v985_v58 = vpop.eup %984 }
 0x1cc   : > { %v987_v4 = vpop.eup %986 }
 0x1cd   : > { %v989_v6 = vpop.eup %988 }
 0x1d7   : > { %v871_v17 = vpop.f32.mrb[0].mxu1 }
 0x1d8   : > { %v885_v16 = vpop.f32.mrb[0].mxu0  ;;  %v505_v22 = vpop.f32.mrb[1].mxu1 }
 0x1d9   : > { %v640_v23 = vadd.f32 %v885_v16, %v871_v17  ;;  %v634_v26 = vpop.f32.mrb[1].mxu0 }
 0x1da   : > { %v635_v20 = vadd.f32 %v634_v26, %v505_v22 }
 0x1db   : > { %v674_v35 = vmul.f32 %v975_v27, %v640_v23 }
 0x1dc   : > { %v673_v25 = vmul.f32 %v977_v32, %v635_v20 }
 0x1dd   : > { %v689_v24 = vadd.f32 %v1509_v21, %v674_v35 }
 0x1de   : > { %v688_v37 = vadd.f32 %v1509_v21, %v673_v25  ;;  %v874_v29 = vpop.f32.mrb[2].mxu1 }
 0x1df   : > { %697 = vst.msk [vmem:[%s1513_s20 + $0x8] sm:$0xff] %vm235_vm0, %v689_v24  ;;  %v888_v38 = vpop.f32.mrb[2].mxu0  ;;  %v515_v39 = vpop.f32.mrb[3].mxu1 }
 0x1e0   : > { %696 = vst.msk [vmem:[%s1513_s20] sm:$0xff] %vm235_vm0, %v688_v37  ;;  %v650_v40 = vadd.f32 %v888_v38, %v874_v29  ;;  %v644_v41 = vpop.f32.mrb[3].mxu0 }
 0x1e1   : > { %v645_v43 = vadd.f32 %v644_v41, %v515_v39 }
 0x1e2   : > { %v676_v45 = vmul.f32 %v979_v42, %v650_v40 }
 0x1e3   : > { %v675_v48 = vmul.f32 %v981_v44, %v645_v43 }
 0x1e4   : > { %v691_v49 = vadd.f32 %v1509_v21, %v676_v45 }
 0x1e5   : > { %v690_v50 = vadd.f32 %v1509_v21, %v675_v48 }
 0x1e6   : > { %699 = vst.msk [vmem:[%s1513_s20 + $0x18] sm:$0xff] %vm235_vm0, %v691_v49  ;;  %v877_v51 = vpop.f32.mrb[4].mxu1  ;;  %v891_v52 = vpop.f32.mrb[4].mxu0 }
 0x1e7   : > { %698 = vst.msk [vmem:[%s1513_s20 + $0x10] sm:$0xff] %vm235_vm0, %v690_v50  ;;  %v660_v53 = vadd.f32 %v891_v52, %v877_v51  ;;  %v525_v54 = vpop.f32.mrb[5].mxu1  ;;  %v654_v55 = vpop.f32.mrb[5].mxu0 }
 0x1e8   : > { %v655_v57 = vadd.f32 %v654_v55, %v525_v54 }
 0x1e9   : > { %v678_v59 = vmul.f32 %v983_v56, %v660_v53 }
 0x1ea   : > { %v677_v60 = vmul.f32 %v985_v58, %v655_v57 }
 0x1eb   : > { %v693_v61 = vadd.f32 %v1509_v21, %v678_v59 }
 0x1ec   : > { %v692_v62 = vadd.f32 %v1509_v21, %v677_v60 }
 0x1ed   : > { %701 = vst.msk [vmem:[%s1513_s20 + $0x28] sm:$0xff] %vm235_vm0, %v693_v61 }
 0x1ee   : > { %700 = vst.msk [vmem:[%s1513_s20 + $0x20] sm:$0xff] %vm235_vm0, %v692_v62  ;;  %v880_v63 = vpop.f32.mrb[6].mxu1  ;;  %v894_v0 = vpop.f32.mrb[6].mxu0 }
 0x1ef   : > { %v670_v1 = vadd.f32 %v894_v0, %v880_v63  ;;  %v535_v2 = vpop.f32.mrb[7].mxu1  ;;  %v664_v3 = vpop.f32.mrb[7].mxu0 }
 0x1f0   : > { %v665_v5 = vadd.f32 %v664_v3, %v535_v2 }
 0x1f1   : > { %v680_v7 = vmul.f32 %v987_v4, %v670_v1 }
 0x1f2   : > { %v679_v8 = vmul.f32 %v989_v6, %v665_v5 }
 0x1f3   : > { %v695_v9 = vadd.f32 %v1509_v21, %v680_v7 }
 0x1f4   : > { %v694_v10 = vadd.f32 %v1509_v21, %v679_v8 }
 0x1f5   : > { %703 = vst.msk [vmem:[%s1513_s20 + $0x38] sm:$0xff] %vm235_vm0, %v695_v9 }
 0x1f6   : > { %702 = vst.msk [vmem:[%s1513_s20 + $0x30] sm:$0xff] %vm235_vm0, %v694_v10 }
 0x1f7   : > { %1089 = shalt.err (!%p1086_p1)
}
 0x1f8   : > { %s1090_s21 = scalar_lea.hbm %s1537_s22, 1024  ;;  %s1094_s4 = scalar_lea.hbm %s1591_s3, 2048 }
 0x1f9   : > { %p1091_p13 = scmp.ne.s32.totalorder %s1537_s22, %s1090_s21  ;;  %p1095_p4 = scmp.lt.u32.totalorder %s1537_s22, %s1591_s3 }
 0x1fa   : > { %p1096_p5 = scmp.lt.u32.totalorder %s1094_s4, %s1090_s21  ;;  %p1098_p11 = scmp.lt.u32.totalorder %s1090_s21, %s1537_s22 }
 0x1fb   : > { %p1092_p6 = pnand %p1091_p13, %p1605_p0 }
 0x1fc   : > { %p1097_p8 = por %p1096_p5, %p1095_p4 }
 0x1fd   : > { %p1093_p10 = pneg %p1092_p6 }
 0x1fe   : > { %p1099_p2 = por %p1098_p11, %p1097_p8 }
 0x200   : > { %p1100_p3 = pnand %p1099_p2, %p1093_p10 }
 0x202   : > { %1103 = shalt.err (!%p1100_p3)
}
 0x203   : > { %s1154_s18 = smov 128   ;;  %s1155_s20 = smov 8  }
 0x204   : > { %913 = dma.vmem_to_hbm [thread:$0]  (%p1605_p0), %s1539_s8, 1024, %s1537_s22, %s705_s16, %s1154_s18, %s1154_s18, %s1155_s20  }
 0x205 PF: > { %s733_s7 = sand.u32 1, %s1134_s12   ;;  %p1606_p7 = scmp.ne.s32.totalorder %s1596_s19, 0 }
 0x206   : > { %p1607_p9 = scmp.ge.s32.totalorder %s1146_s15, 2  ;;  %s734_s26 = scalar_lea.sflag [#allocation4], %s733_s7 }
 0x208   : > { %p927_p12 = pnand %p1607_p9, %p1606_p7 }
 0x20a   : > { %1129 = dma.done.wait (!%p927_p12), %s734_s26, 1024  }
 0x20b   : > { %1131 = vsyncadd (!%p927_p12), %s734_s26, 4294966272  ;;  %p17_p1 = scmp.ge.s32.totalorder %s1290_s5, 4   ;;  %s1608_s12 = smov %s1138_s13 }
 0x20c   : > { %s1609_s13 = smov %s1142_s14  ;;  %s1610_s14 = smov %s1306_s10 }
 0x20d   : > { %s1611_s15 = smov %s1290_s5  ;;  %19 = sbr.rel (!%p17_p1) target bundleno = 6 (0x6), region = 86 }
 0x214   :  { %739 = vsyncpa [#allocation3], 1 }
 0x215   :  { %741 = vsyncpa [#allocation3 + $0x1], 1 }
 0x216   :  { %742 = vsyncpa [#allocation6], 1 }
 0x217   :  { %743 = vsyncpa [#allocation4], 1 }
 0x218   :  { %745 = vsyncpa [#allocation4 + $0x1], 1 }

</bundles_post_ra>
